<compile_context>
chip_gen: v6e
topology: v6e:2x2x1
jax: 0.10.0
libtpu: 0.0.40
codegen_flags: <defaults>
</compile_context>

<pallas_src>
import jax
import jax.numpy as jnp
from jax.experimental import pallas as pl
from jax.experimental.pallas import tpu as pltpu

T_REDUCE = 2
THRESHOLD = 1.0


def _spikepool_kernel(x_ref, o_ref):
    # x_ref block: (T_layer, Tc, 2, 2, HW, G)  (2x2 pool window on outer axes, channels on lanes)
    # o_ref block: (T_nxt,  Tc,        HW, G)
    T_layer, Tc = x_ref.shape[0], x_ref.shape[1]
    T_nxt = o_ref.shape[0]
    HW, G = o_ref.shape[2], o_ref.shape[3]

    th = jnp.float32(THRESHOLD - 0.001)
    inv_th = jnp.float32(1.0 / (THRESHOLD - 0.001))          # compile-time constant reciprocal
    inv_cnt = jnp.float32(1.0 / (4.0 * T_layer))

    # --- snn.pool(2) + mean over T_layer chunks: term-by-term accumulation (pure VPU) ----------
    # keeps peak live temporaries ~ one (Tc, HW, G) f32 plane instead of a full f32 input copy.
    acc = jnp.zeros((Tc, HW, G), jnp.float32)
    for j in range(T_layer):
        for a in range(2):
            for b in range(2):
                acc = acc + x_ref[j, :, a, b, :, :].astype(jnp.float32)
    m = acc * inv_cnt                                        # (Tc, HW, G)

    # --- get_spike(x_out, threshold=1, p=T_nxt): soft-reset integrate-and-fire -----------------
    for i in range(T_nxt):
        if i == 0:
            inp = m                                          # (0 * m) % th == 0 exactly
        else:
            im = jnp.float32(i) * m
            inp = im - th * jnp.floor(im * inv_th) + m       # im % th without the divide
        v = jnp.zeros((HW, G), jnp.float32)
        for t in range(Tc):
            v = v + inp[t]
            s = v >= th
            v = v - th * s.astype(jnp.float32)
            o_ref[i, t] = s.astype(o_ref.dtype)              # lane-dense per-slice store


def _vmem_budget_bytes():
    """Generation-aware budget for the total (double-buffered in+out + f32 temporaries) footprint.
    Measured elementwise tiling data shows ~4-8 MiB blocks already sit at the HBM roofline, so
    stay well under every generation's scoped-VMEM limit (16 MiB v5e, 32 MiB v6e/v7x default)."""
    cap = 64 * 1024 * 1024
    try:
        cap = int(getattr(pltpu.get_tpu_info(), "vmem_capacity_bytes", cap))
    except Exception:
        pass
    return max(2 * 1024 * 1024, min(cap // 5, 12 * 1024 * 1024))


def _pick_channel_group(NCp, per_channel_bytes, budget_bytes):
    """Largest lane-dense channel group G (multiple of 128, divides NCp) whose modeled footprint
    fits the VMEM budget, preferring >=4 grid steps (megacore split on v7x + DMA/compute overlap)."""
    nlanes = NCp // 128
    candidates = [k * 128 for k in range(1, nlanes + 1) if nlanes % k == 0]
    for need_steps in (4, 2, 1):
        feas = [G for G in candidates
                if G * per_channel_bytes <= budget_bytes and NCp // G >= need_steps]
        if feas:
            return max(feas)
    return 128


def spike_pool_forward(x, T_layer=T_REDUCE, T_nxt=T_REDUCE):
    """x: (N, C, H, W, T) float (f32 or bf16); returns (N, C, H//2, W//2, T_nxt*(T//T_layer)) f32."""
    N, C, H, W, T = x.shape
    assert T % T_layer == 0 and H % 2 == 0 and W % 2 == 0
    Tc = T // T_layer
    Hh, Wh = H // 2, W // 2
    HW = Hh * Wh
    NC = N * C
    NCp = ((NC + 127) // 128) * 128          # pad fused channels to a lane-dense multiple of 128

    # (N, C, H, W, T) -> (T_layer, Tc, 2, 2, Hh*Wh, N*C): 2x2 window offsets on outer axes,
    # spatial dims fused second-minor (full tiles), fused channels on the TPU lane dim.
    # allow_input_fusion below lets XLA fold this transpose into the pallas_call operand.
    xr = x.reshape(N, C, Hh, 2, Wh, 2, T_layer, Tc)
    xr = jnp.transpose(xr, (6, 7, 3, 5, 2, 4, 0, 1)).reshape(T_layer, Tc, 2, 2, HW, NC)
    if NCp != NC:
        xr = jnp.pad(xr, [(0, 0)] * 5 + [(0, NCp - NC)])

    per_ch = (2 * T_layer * Tc * 4 * HW * x.dtype.itemsize   # double-buffered input block
              + 2 * T_nxt * Tc * HW * 2                      # double-buffered bf16 output block
              + 4 * Tc * HW * 4)                             # in-kernel f32 temporaries (acc/m/inp/v)
    G = _pick_channel_group(NCp, per_ch, _vmem_budget_bytes())

    out = pl.pallas_call(
        _spikepool_kernel,
        out_shape=jax.ShapeDtypeStruct((T_nxt, Tc, HW, NCp), jnp.bfloat16),
        grid=(NCp // G,),
        in_specs=[pl.BlockSpec((T_layer, Tc, 2, 2, HW, G),
                               lambda g: (0, 0, 0, 0, 0, g))],
        out_specs=pl.BlockSpec((T_nxt, Tc, HW, G),
                               lambda g: (0, 0, 0, g)),
        compiler_params=pltpu.CompilerParams(
            dimension_semantics=("parallel",),
            allow_input_fusion=[True],
            vmem_limit_bytes=32 * 1024 * 1024),
    )(xr)

    # (T_nxt, Tc, HW, NCp) -> (N, C, Hh, Wh, T_nxt*Tc) f32  (matches torch.cat(..., dim=-1))
    out = out[..., :NC].reshape(T_nxt, Tc, Hh, Wh, N, C)
    out = jnp.transpose(out, (4, 5, 2, 3, 0, 1)).astype(jnp.float32)
    return out.reshape(N, C, Hh, Wh, T_nxt * Tc)


def spike_pool_reference(x, T_layer=T_REDUCE, T_nxt=T_REDUCE):
    """Pure-JAX reference mirroring the PyTorch forward, for correctness checking."""
    N, C, H, W, T = x.shape
    Tc = T // T_layer
    x = x.astype(jnp.float32)
    pooled = []
    for j in range(T_layer):
        cj = x[..., j * Tc:(j + 1) * Tc]                                   # (N,C,H,W,Tc)
        cj = cj.reshape(N, C, H // 2, 2, W // 2, 2, Tc).mean(axis=(3, 5))  # 2x2 avg pool
        pooled.append(cj)
    x_out = jnp.stack(pooled).mean(axis=0)                                 # (N,C,Hh,Wh,Tc)
    th = jnp.float32(THRESHOLD - 0.001)
    outs = []
    for i in range(T_nxt):
        inp = (jnp.float32(i) * x_out) % th + x_out
        v = jnp.zeros(inp.shape[:-1], jnp.float32)
        ss = []
        for t in range(Tc):
            v = v + inp[..., t]
            s = (v >= th).astype(jnp.float32)
            v = v - th * s
            ss.append(s)
        outs.append(jnp.stack(ss, axis=-1))
    return jnp.concatenate(outs, axis=-1)


if __name__ == "__main__":
    key = jax.random.PRNGKey(0)
    N, C, H, W = 2, 4, 16, 16
    T_layer = T_nxt = T_REDUCE
    T = 4                      # -> Tc = 2 time steps per chunk

    # binary spike-train input, as produced by an upstream spiking layer
    x = (jax.random.uniform(key, (N, C, H, W, T)) < 0.7).astype(jnp.float32)

    out = jax.block_until_ready(spike_pool_forward(x, T_layer=T_layer, T_nxt=T_nxt))
    ref = spike_pool_reference(x, T_layer=T_layer, T_nxt=T_nxt)

    Tc = T // T_layer
    assert out.shape == (N, C, H // 2, W // 2, T_nxt * Tc), out.shape
    assert bool(jnp.allclose(out, ref)), "Pallas kernel disagrees with pure-JAX reference"

    print("KERNEL_OK")
</pallas_src>

<mosaic_0001>
module attributes {stable_mosaic.version = 11 : i64} {
  func.func @_spikepool_kernel(%arg0: i32, %arg1: memref<2x2x2x2x64x128xf32, #tpu.memory_space<vmem>>, %arg2: memref<2x2x64x128xbf16, #tpu.memory_space<vmem>>) attributes {dimension_semantics = [#tpu.dimension_semantics<parallel>], iteration_bounds = array<i64: 1>, scalar_prefetch = 0 : i64, scratch_operands = 0 : i64, tpu.core_type = #tpu.core_type<tc>, window_params = [{transform_indices = @transform_0, window_bounds = array<i64: 2, 2, 2, 2, 64, 128>}, {transform_indices = @transform_1, window_bounds = array<i64: 2, 2, 64, 128>}]} {
    %cst = arith.constant 0.000000e+00 : f32
    %0 = vector.broadcast %cst : f32 to vector<2x64x128xf32>
    %c0 = arith.constant 0 : index
    %c0_0 = arith.constant 0 : index
    %c0_1 = arith.constant 0 : index
    %c0_2 = arith.constant 0 : index
    %c0_3 = arith.constant 0 : index
    %c0_4 = arith.constant 0 : index
    %1 = vector.load %arg1[%c0, %c0_0, %c0_1, %c0_2, %c0_3, %c0_4] : memref<2x2x2x2x64x128xf32, #tpu.memory_space<vmem>>, vector<1x2x1x1x64x128xf32>
    %2 = vector.shape_cast %1 : vector<1x2x1x1x64x128xf32> to vector<2x64x128xf32>
    %3 = arith.addf %0, %2 : vector<2x64x128xf32>
    %c0_5 = arith.constant 0 : index
    %c0_6 = arith.constant 0 : index
    %c0_7 = arith.constant 0 : index
    %c1 = arith.constant 1 : index
    %c0_8 = arith.constant 0 : index
    %c0_9 = arith.constant 0 : index
    %4 = vector.load %arg1[%c0_5, %c0_6, %c0_7, %c1, %c0_8, %c0_9] : memref<2x2x2x2x64x128xf32, #tpu.memory_space<vmem>>, vector<1x2x1x1x64x128xf32>
    %5 = vector.shape_cast %4 : vector<1x2x1x1x64x128xf32> to vector<2x64x128xf32>
    %6 = arith.addf %3, %5 : vector<2x64x128xf32>
    %c0_10 = arith.constant 0 : index
    %c0_11 = arith.constant 0 : index
    %c1_12 = arith.constant 1 : index
    %c0_13 = arith.constant 0 : index
    %c0_14 = arith.constant 0 : index
    %c0_15 = arith.constant 0 : index
    %7 = vector.load %arg1[%c0_10, %c0_11, %c1_12, %c0_13, %c0_14, %c0_15] : memref<2x2x2x2x64x128xf32, #tpu.memory_space<vmem>>, vector<1x2x1x1x64x128xf32>
    %8 = vector.shape_cast %7 : vector<1x2x1x1x64x128xf32> to vector<2x64x128xf32>
    %9 = arith.addf %6, %8 : vector<2x64x128xf32>
    %c0_16 = arith.constant 0 : index
    %c0_17 = arith.constant 0 : index
    %c1_18 = arith.constant 1 : index
    %c1_19 = arith.constant 1 : index
    %c0_20 = arith.constant 0 : index
    %c0_21 = arith.constant 0 : index
    %10 = vector.load %arg1[%c0_16, %c0_17, %c1_18, %c1_19, %c0_20, %c0_21] : memref<2x2x2x2x64x128xf32, #tpu.memory_space<vmem>>, vector<1x2x1x1x64x128xf32>
    %11 = vector.shape_cast %10 : vector<1x2x1x1x64x128xf32> to vector<2x64x128xf32>
    %12 = arith.addf %9, %11 : vector<2x64x128xf32>
    %c1_22 = arith.constant 1 : index
    %c0_23 = arith.constant 0 : index
    %c0_24 = arith.constant 0 : index
    %c0_25 = arith.constant 0 : index
    %c0_26 = arith.constant 0 : index
    %c0_27 = arith.constant 0 : index
    %13 = vector.load %arg1[%c1_22, %c0_23, %c0_24, %c0_25, %c0_26, %c0_27] : memref<2x2x2x2x64x128xf32, #tpu.memory_space<vmem>>, vector<1x2x1x1x64x128xf32>
    %14 = vector.shape_cast %13 : vector<1x2x1x1x64x128xf32> to vector<2x64x128xf32>
    %15 = arith.addf %12, %14 : vector<2x64x128xf32>
    %c1_28 = arith.constant 1 : index
    %c0_29 = arith.constant 0 : index
    %c0_30 = arith.constant 0 : index
    %c1_31 = arith.constant 1 : index
    %c0_32 = arith.constant 0 : index
    %c0_33 = arith.constant 0 : index
    %16 = vector.load %arg1[%c1_28, %c0_29, %c0_30, %c1_31, %c0_32, %c0_33] : memref<2x2x2x2x64x128xf32, #tpu.memory_space<vmem>>, vector<1x2x1x1x64x128xf32>
    %17 = vector.shape_cast %16 : vector<1x2x1x1x64x128xf32> to vector<2x64x128xf32>
    %18 = arith.addf %15, %17 : vector<2x64x128xf32>
    %c1_34 = arith.constant 1 : index
    %c0_35 = arith.constant 0 : index
    %c1_36 = arith.constant 1 : index
    %c0_37 = arith.constant 0 : index
    %c0_38 = arith.constant 0 : index
    %c0_39 = arith.constant 0 : index
    %19 = vector.load %arg1[%c1_34, %c0_35, %c1_36, %c0_37, %c0_38, %c0_39] : memref<2x2x2x2x64x128xf32, #tpu.memory_space<vmem>>, vector<1x2x1x1x64x128xf32>
    %20 = vector.shape_cast %19 : vector<1x2x1x1x64x128xf32> to vector<2x64x128xf32>
    %21 = arith.addf %18, %20 : vector<2x64x128xf32>
    %c1_40 = arith.constant 1 : index
    %c0_41 = arith.constant 0 : index
    %c1_42 = arith.constant 1 : index
    %c1_43 = arith.constant 1 : index
    %c0_44 = arith.constant 0 : index
    %c0_45 = arith.constant 0 : index
    %22 = vector.load %arg1[%c1_40, %c0_41, %c1_42, %c1_43, %c0_44, %c0_45] : memref<2x2x2x2x64x128xf32, #tpu.memory_space<vmem>>, vector<1x2x1x1x64x128xf32>
    %23 = vector.shape_cast %22 : vector<1x2x1x1x64x128xf32> to vector<2x64x128xf32>
    %24 = arith.addf %21, %23 : vector<2x64x128xf32>
    %cst_46 = arith.constant 1.250000e-01 : f32
    %25 = vector.broadcast %cst_46 : f32 to vector<2x64x128xf32>
    %26 = arith.mulf %24, %25 : vector<2x64x128xf32>
    %cst_47 = arith.constant 0.000000e+00 : f32
    %27 = vector.broadcast %cst_47 : f32 to vector<64x128xf32>
    %28 = vector.extract_strided_slice %26 {offsets = [0, 0, 0], sizes = [1, 64, 128], strides = [1, 1, 1]} : vector<2x64x128xf32> to vector<1x64x128xf32>
    %29 = vector.shape_cast %28 : vector<1x64x128xf32> to vector<64x128xf32>
    %30 = arith.addf %27, %29 : vector<64x128xf32>
    %cst_48 = arith.constant 9.990000e-01 : f32
    %31 = vector.broadcast %cst_48 : f32 to vector<64x128xf32>
    %32 = arith.cmpf oge, %30, %31 : vector<64x128xf32>
    %33 = arith.extui %32 : vector<64x128xi1> to vector<64x128xi32>
    %34 = arith.sitofp %33 : vector<64x128xi32> to vector<64x128xf32>
    %cst_49 = arith.constant 9.990000e-01 : f32
    %35 = vector.broadcast %cst_49 : f32 to vector<64x128xf32>
    %36 = arith.mulf %35, %34 : vector<64x128xf32>
    %37 = arith.subf %30, %36 : vector<64x128xf32>
    %38 = arith.extui %32 : vector<64x128xi1> to vector<64x128xi32>
    %39 = arith.sitofp %38 : vector<64x128xi32> to vector<64x128xf32>
    %40 = arith.truncf %39 : vector<64x128xf32> to vector<64x128xbf16>
    %c0_50 = arith.constant 0 : index
    %c0_51 = arith.constant 0 : index
    %c0_52 = arith.constant 0 : index
    %c0_53 = arith.constant 0 : index
    %41 = vector.load %arg2[%c0_50, %c0_51, %c0_52, %c0_53] : memref<2x2x64x128xbf16, #tpu.memory_space<vmem>>, vector<1x1x64x128xbf16>
    %42 = vector.shape_cast %41 : vector<1x1x64x128xbf16> to vector<64x128xbf16>
    %43 = vector.shape_cast %40 : vector<64x128xbf16> to vector<1x1x64x128xbf16>
    tpu.vector_store %arg2[%c0_50, %c0_51, %c0_52, %c0_53], %43 {strides = array<i32>} : memref<2x2x64x128xbf16, #tpu.memory_space<vmem>>, vector<1x1x64x128xbf16>,
    %44 = vector.extract_strided_slice %26 {offsets = [1, 0, 0], sizes = [1, 64, 128], strides = [1, 1, 1]} : vector<2x64x128xf32> to vector<1x64x128xf32>
    %45 = vector.shape_cast %44 : vector<1x64x128xf32> to vector<64x128xf32>
    %46 = arith.addf %37, %45 : vector<64x128xf32>
    %cst_54 = arith.constant 9.990000e-01 : f32
    %47 = vector.broadcast %cst_54 : f32 to vector<64x128xf32>
    %48 = arith.cmpf oge, %46, %47 : vector<64x128xf32>
    %49 = arith.extui %48 : vector<64x128xi1> to vector<64x128xi32>
    %50 = arith.sitofp %49 : vector<64x128xi32> to vector<64x128xf32>
    %51 = arith.truncf %50 : vector<64x128xf32> to vector<64x128xbf16>
    %c0_55 = arith.constant 0 : index
    %c1_56 = arith.constant 1 : index
    %c0_57 = arith.constant 0 : index
    %c0_58 = arith.constant 0 : index
    %52 = vector.load %arg2[%c0_55, %c1_56, %c0_57, %c0_58] : memref<2x2x64x128xbf16, #tpu.memory_space<vmem>>, vector<1x1x64x128xbf16>
    %53 = vector.shape_cast %52 : vector<1x1x64x128xbf16> to vector<64x128xbf16>
    %54 = vector.shape_cast %51 : vector<64x128xbf16> to vector<1x1x64x128xbf16>
    tpu.vector_store %arg2[%c0_55, %c1_56, %c0_57, %c0_58], %54 {strides = array<i32>} : memref<2x2x64x128xbf16, #tpu.memory_space<vmem>>, vector<1x1x64x128xbf16>,
    %cst_59 = arith.constant 1.000000e+00 : f32
    %55 = vector.broadcast %cst_59 : f32 to vector<2x64x128xf32>
    %56 = arith.mulf %55, %26 : vector<2x64x128xf32>
    %cst_60 = arith.constant 1.001001 : f32
    %57 = vector.broadcast %cst_60 : f32 to vector<2x64x128xf32>
    %58 = arith.mulf %56, %57 : vector<2x64x128xf32>
    %59 = math.floor %58 : vector<2x64x128xf32>
    %cst_61 = arith.constant 9.990000e-01 : f32
    %60 = vector.broadcast %cst_61 : f32 to vector<2x64x128xf32>
    %61 = arith.mulf %60, %59 : vector<2x64x128xf32>
    %62 = arith.subf %56, %61 : vector<2x64x128xf32>
    %63 = arith.addf %62, %26 : vector<2x64x128xf32>
    %cst_62 = arith.constant 0.000000e+00 : f32
    %64 = vector.broadcast %cst_62 : f32 to vector<64x128xf32>
    %65 = vector.extract_strided_slice %63 {offsets = [0, 0, 0], sizes = [1, 64, 128], strides = [1, 1, 1]} : vector<2x64x128xf32> to vector<1x64x128xf32>
    %66 = vector.shape_cast %65 : vector<1x64x128xf32> to vector<64x128xf32>
    %67 = arith.addf %64, %66 : vector<64x128xf32>
    %cst_63 = arith.constant 9.990000e-01 : f32
    %68 = vector.broadcast %cst_63 : f32 to vector<64x128xf32>
    %69 = arith.cmpf oge, %67, %68 : vector<64x128xf32>
    %70 = arith.extui %69 : vector<64x128xi1> to vector<64x128xi32>
    %71 = arith.sitofp %70 : vector<64x128xi32> to vector<64x128xf32>
    %cst_64 = arith.constant 9.990000e-01 : f32
    %72 = vector.broadcast %cst_64 : f32 to vector<64x128xf32>
    %73 = arith.mulf %72, %71 : vector<64x128xf32>
    %74 = arith.subf %67, %73 : vector<64x128xf32>
    %75 = arith.extui %69 : vector<64x128xi1> to vector<64x128xi32>
    %76 = arith.sitofp %75 : vector<64x128xi32> to vector<64x128xf32>
    %77 = arith.truncf %76 : vector<64x128xf32> to vector<64x128xbf16>
    %c1_65 = arith.constant 1 : index
    %c0_66 = arith.constant 0 : index
    %c0_67 = arith.constant 0 : index
    %c0_68 = arith.constant 0 : index
    %78 = vector.load %arg2[%c1_65, %c0_66, %c0_67, %c0_68] : memref<2x2x64x128xbf16, #tpu.memory_space<vmem>>, vector<1x1x64x128xbf16>
    %79 = vector.shape_cast %78 : vector<1x1x64x128xbf16> to vector<64x128xbf16>
    %80 = vector.shape_cast %77 : vector<64x128xbf16> to vector<1x1x64x128xbf16>
    tpu.vector_store %arg2[%c1_65, %c0_66, %c0_67, %c0_68], %80 {strides = array<i32>} : memref<2x2x64x128xbf16, #tpu.memory_space<vmem>>, vector<1x1x64x128xbf16>,
    %81 = vector.extract_strided_slice %63 {offsets = [1, 0, 0], sizes = [1, 64, 128], strides = [1, 1, 1]} : vector<2x64x128xf32> to vector<1x64x128xf32>
    %82 = vector.shape_cast %81 : vector<1x64x128xf32> to vector<64x128xf32>
    %83 = arith.addf %74, %82 : vector<64x128xf32>
    %cst_69 = arith.constant 9.990000e-01 : f32
    %84 = vector.broadcast %cst_69 : f32 to vector<64x128xf32>
    %85 = arith.cmpf oge, %83, %84 : vector<64x128xf32>
    %86 = arith.extui %85 : vector<64x128xi1> to vector<64x128xi32>
    %87 = arith.sitofp %86 : vector<64x128xi32> to vector<64x128xf32>
    %88 = arith.truncf %87 : vector<64x128xf32> to vector<64x128xbf16>
    %c1_70 = arith.constant 1 : index
    %c1_71 = arith.constant 1 : index
    %c0_72 = arith.constant 0 : index
    %c0_73 = arith.constant 0 : index
    %89 = vector.load %arg2[%c1_70, %c1_71, %c0_72, %c0_73] : memref<2x2x64x128xbf16, #tpu.memory_space<vmem>>, vector<1x1x64x128xbf16>
    %90 = vector.shape_cast %89 : vector<1x1x64x128xbf16> to vector<64x128xbf16>
    %91 = vector.shape_cast %88 : vector<64x128xbf16> to vector<1x1x64x128xbf16>
    tpu.vector_store %arg2[%c1_70, %c1_71, %c0_72, %c0_73], %91 {strides = array<i32>} : memref<2x2x64x128xbf16, #tpu.memory_space<vmem>>, vector<1x1x64x128xbf16>,
    return
  }
  func.func @transform_0(%arg0: i32) -> (i32, i32, i32, i32, i32, i32) {
    %c0_i32 = arith.constant 0 : i32
    %c0_i32_0 = arith.constant 0 : i32
    %c0_i32_1 = arith.constant 0 : i32
    %c0_i32_2 = arith.constant 0 : i32
    %c0_i32_3 = arith.constant 0 : i32
    %c0_i32_4 = arith.constant 0 : i32
    return %c0_i32, %c0_i32_0, %c0_i32_1, %c0_i32_2, %c0_i32_3, %arg0 : i32, i32, i32, i32, i32, i32
  }
  func.func @transform_1(%arg0: i32) -> (i32, i32, i32, i32) {
    %c0_i32 = arith.constant 0 : i32
    %c0_i32_0 = arith.constant 0 : i32
    %c0_i32_1 = arith.constant 0 : i32
    %c0_i32_2 = arith.constant 0 : i32
    return %c0_i32, %c0_i32_0, %c0_i32_1, %arg0 : i32, i32, i32, i32
  }
}

</mosaic_0001>

<bundles_post_ra>
// kernel: tpu_custom_call.1
= control target key start
LH: loop header
LB: loop body
LE: loop exit
PB: predicated region body
PF: predicated region fallthrough
CT: control target
= control target key end

     0   :  { %6 = vsyncpa [#allocation3], 0  ;;  %s1180_s0 = inlined_call_operand.hbm [shape: f32[2,2,2,2,64,128], index: 0, kind: input, shape index: {}]   ;;  %s1181_s1 = inlined_call_operand.hbm [shape: bf16[2,2,64,128], index: 1, kind: output, shape index: {}]  }
   0x1   :  { %7 = vsyncpa [#allocation4], 0  ;;  %s929_s6 = smov [#allocation2]  }
   0x2   :  { %s13_s7 = sshll.u32 %s929_s6, 4  ;;  %s14_s7 = int_to_ptr.vmem [resolvable:$true] %s13_s7 }
   0x3   :  { %s893_s8 = scalar_lea.vmem %s14_s7, 16384  ;;  %p898_p1 = scmp.lt.s32.totalorder %s14_s7, %s14_s7 }
   0x4   :  { %p894_p0 = scmp.ne.s32.totalorder %s14_s7, %s893_s8  ;;  %p899_p2 = scmp.lt.s32.totalorder %s893_s8, %s893_s8 }
   0x6   :  { %p900_p3 = por %p899_p2, %p898_p1 }
   0x8   :  { %p901_p4 = pnand %p900_p3, %p894_p0 }
   0xa   :  { %904 = shalt.err (!%p901_p4)
}
   0xb   :  { %s930_s9 = smov 128   ;;  %s931_s10 = smov 8  }
   0xc   :  { %19 = dma.hbm_to_vmem [thread:$0]  %s1180_s0, 16384, %s14_s7, [#allocation3], %s930_s9, %s930_s9, %s931_s10  }
   0xd   :  { %925 = dma.done.wait [#allocation3], 16384  }
   0xe   :  { %926 = vsyncadd [#allocation3], 4294950912  ;;  %v23_v0 = vld [vmem:[#allocation2] sm:$0xff]  ;;  %v24_v1 = vld [vmem:[#allocation2 + $0x8] sm:$0xff]  ;;  %s933_s0 = smov [#allocation5]  }
   0xf   :  { %v56_v2 = vld [vmem:[#allocation2 + $0x40] sm:$0xff]  ;;  %v57_v3 = vld [vmem:[#allocation2 + $0x48] sm:$0xff]  ;;  %v25_v16 = vld [vmem:[#allocation2 + $0x10] sm:$0xff]  ;;  %s710_s13 = sshll.u32 %s933_s0, 4  ;;  %s711_s13 = int_to_ptr.vmem [resolvable:$true] %s710_s13 }
  0x10   :  { %v72_v4 = vadd.f32 %v56_v2, %v23_v0  ;;  %v89_v5 = vld [vmem:[#allocation2 + $0x80] sm:$0xff]  ;;  %v90_v6 = vld [vmem:[#allocation2 + $0x88] sm:$0xff]  ;;  %v73_v7 = vadd.f32 %v57_v3, %v24_v1  ;;  %v26_v17 = vld [vmem:[#allocation2 + $0x18] sm:$0xff]  ;;  %s905_s14 = scalar_lea.vmem %s711_s13, 2048  ;;  %p910_p6 = scmp.lt.s32.totalorder %s711_s13, %s711_s13 }
  0x11   :  { %v122_v8 = vld [vmem:[#allocation2 + $0xc0] sm:$0xff]  ;;  %v123_v10 = vld [vmem:[#allocation2 + $0xc8] sm:$0xff]  ;;  %v58_v19 = vld [vmem:[#allocation2 + $0x50] sm:$0xff]  ;;  %p906_p5 = scmp.ne.s32.totalorder %s711_s13, %s905_s14  ;;  %p911_p7 = scmp.lt.s32.totalorder %s905_s14, %s905_s14 }
  0x12   :  { %v105_v9 = vadd.f32 %v89_v5, %v72_v4  ;;  %v106_v11 = vadd.f32 %v90_v6, %v73_v7  ;;  %v155_v12 = vld [vmem:[#allocation2 + $0x200] sm:$0xff]  ;;  %v156_v13 = vld [vmem:[#allocation2 + $0x208] sm:$0xff]  ;;  %v59_v20 = vld [vmem:[#allocation2 + $0x58] sm:$0xff]  ;;  %v74_v25 = vadd.f32 %v58_v19, %v25_v16 }
  0x13   :  { %v188_v15 = vld [vmem:[#allocation2 + $0x240] sm:$0xff]  ;;  %v91_v21 = vld [vmem:[#allocation2 + $0x90] sm:$0xff]  ;;  %v189_v23 = vld [vmem:[#allocation2 + $0x248] sm:$0xff]  ;;  %v75_v26 = vadd.f32 %v59_v20, %v26_v17  ;;  %v932_v17 = vmov 0.0   ;;  %p912_p8 = por %p911_p7, %p910_p6 }
  0x14   :  { %v138_v14 = vadd.f32 %v122_v8, %v105_v9  ;;  %v139_v18 = vadd.f32 %v123_v10, %v106_v11  ;;  %v221_v24 = vld [vmem:[#allocation2 + $0x280] sm:$0xff]  ;;  %v92_v27 = vld [vmem:[#allocation2 + $0x98] sm:$0xff]  ;;  %v222_v29 = vld [vmem:[#allocation2 + $0x288] sm:$0xff]  ;;  %v107_v35 = vadd.f32 %v91_v21, %v74_v25 }
  0x15   :  { %v124_v30 = vld [vmem:[#allocation2 + $0xd0] sm:$0xff]  ;;  %v125_v31 = vld [vmem:[#allocation2 + $0xd8] sm:$0xff]  ;;  %v254_v33 = vld [vmem:[#allocation2 + $0x2c0] sm:$0xff]  ;;  %v108_v36 = vadd.f32 %v92_v27, %v75_v26  ;;  %p913_p9 = pnand %p912_p8, %p906_p5 }
  0x16   :  { %v171_v22 = vadd.f32 %v155_v12, %v138_v14  ;;  %v172_v28 = vadd.f32 %v156_v13, %v139_v18  ;;  %v255_v34 = vld [vmem:[#allocation2 + $0x2c8] sm:$0xff]  ;;  %v157_v37 = vld [vmem:[#allocation2 + $0x210] sm:$0xff]  ;;  %v158_v39 = vld [vmem:[#allocation2 + $0x218] sm:$0xff]  ;;  %v140_v43 = vadd.f32 %v124_v30, %v107_v35 }
  0x17   :  { %v190_v40 = vld [vmem:[#allocation2 + $0x250] sm:$0xff]  ;;  %v27_v41 = vld [vmem:[#allocation2 + $0x20] sm:$0xff]  ;;  %v141_v44 = vadd.f32 %v125_v31, %v108_v36  ;;  %v28_v45 = vld [vmem:[#allocation2 + $0x28] sm:$0xff] }
  0x18   :  { %v204_v32 = vadd.f32 %v188_v15, %v171_v22  ;;  %v205_v38 = vadd.f32 %v189_v23, %v172_v28  ;;  %v60_v46 = vld [vmem:[#allocation2 + $0x60] sm:$0xff]  ;;  %v61_v47 = vld [vmem:[#allocation2 + $0x68] sm:$0xff]  ;;  %v191_v49 = vld [vmem:[#allocation2 + $0x258] sm:$0xff]  ;;  %v173_v55 = vadd.f32 %v157_v37, %v140_v43 }
  0x19   :  { %v76_v50 = vadd.f32 %v60_v46, %v27_v41  ;;  %v77_v51 = vadd.f32 %v61_v47, %v28_v45  ;;  %v93_v52 = vld [vmem:[#allocation2 + $0xa0] sm:$0xff]  ;;  %v94_v53 = vld [vmem:[#allocation2 + $0xa8] sm:$0xff]  ;;  %v174_v56 = vadd.f32 %v158_v39, %v141_v44  ;;  %v223_v60 = vld [vmem:[#allocation2 + $0x290] sm:$0xff] }
  0x1a   :  { %v237_v42 = vadd.f32 %v221_v24, %v204_v32  ;;  %v238_v48 = vadd.f32 %v222_v29, %v205_v38  ;;  %v126_v57 = vld [vmem:[#allocation2 + $0xe0] sm:$0xff]  ;;  %v127_v58 = vld [vmem:[#allocation2 + $0xe8] sm:$0xff]  ;;  %v224_v61 = vld [vmem:[#allocation2 + $0x298] sm:$0xff]  ;;  %v206_v1 = vadd.f32 %v190_v40, %v173_v55 }
  0x1b   :  { %v109_v62 = vadd.f32 %v93_v52, %v76_v50  ;;  %v110_v63 = vadd.f32 %v94_v53, %v77_v51  ;;  %v207_v2 = vadd.f32 %v191_v49, %v174_v56  ;;  %v256_v3 = vld [vmem:[#allocation2 + $0x2d0] sm:$0xff]  ;;  %v159_v4 = vld [vmem:[#allocation2 + $0x220] sm:$0xff]  ;;  %v160_v5 = vld [vmem:[#allocation2 + $0x228] sm:$0xff] }
  0x1c   :  { %v270_v54 = vadd.f32 %v254_v33, %v237_v42  ;;  %v271_v59 = vadd.f32 %v255_v34, %v238_v48  ;;  %v257_v7 = vld [vmem:[#allocation2 + $0x2d8] sm:$0xff]  ;;  %v29_v10 = vld [vmem:[#allocation2 + $0x30] sm:$0xff]  ;;  %v239_v12 = vadd.f32 %v223_v60, %v206_v1  ;;  %v192_v14 = vld [vmem:[#allocation2 + $0x260] sm:$0xff] }
  0x1d   :  { %v142_v8 = vadd.f32 %v126_v57, %v109_v62  ;;  %v143_v9 = vadd.f32 %v127_v58, %v110_v63  ;;  %v62_v11 = vld [vmem:[#allocation2 + $0x70] sm:$0xff]  ;;  %v240_v13 = vadd.f32 %v224_v61, %v207_v2  ;;  %v193_v15 = vld [vmem:[#allocation2 + $0x268] sm:$0xff]  ;;  %v30_v21 = vld [vmem:[#allocation2 + $0x38] sm:$0xff] }
  0x1e   :  { %v949_v0 = vmul.f32 0.125, %v270_v54  ;;  %v951_v6 = vmul.f32 0.125, %v271_v59  ;;  %v78_v16 = vadd.f32 %v62_v11, %v29_v10  ;;  %v63_v22 = vld [vmem:[#allocation2 + $0x78] sm:$0xff]  ;;  %v272_v25 = vadd.f32 %v256_v3, %v239_v12  ;;  %v225_v27 = vld [vmem:[#allocation2 + $0x2a0] sm:$0xff]  ;;  %v226_v28 = vld [vmem:[#allocation2 + $0x2a8] sm:$0xff] }
  0x1f   :  { %v175_v19 = vadd.f32 %v159_v4, %v142_v8  ;;  %v176_v20 = vadd.f32 %v160_v5, %v143_v9  ;;  %v273_v26 = vadd.f32 %v257_v7, %v240_v13  ;;  %v95_v29 = vld [vmem:[#allocation2 + $0xb0] sm:$0xff]  ;;  %v258_v33 = vld [vmem:[#allocation2 + $0x2e0] sm:$0xff]  ;;  %v96_v34 = vld [vmem:[#allocation2 + $0xb8] sm:$0xff]  ;;  %v79_v39 = vadd.f32 %v63_v22, %v30_v21 }
  0x20   :  { %vm310_vm0 = vcmp.ge.f32.partialorder %v949_v0, 0.999  ;;  %vm311_vm1 = vcmp.ge.f32.partialorder %v951_v6, 0.999  ;;  %v961_v36 = vmul.f32 0.125, %v272_v25  ;;  %v259_v38 = vld [vmem:[#allocation2 + $0x2e8] sm:$0xff]  ;;  %v111_v44 = vadd.f32 %v95_v29, %v78_v16 }
  0x21   :  { %v722_v18 = vsel %vm310_vm0, 1.0, %v932_v17  ;;  %v723_v23 = vsel %vm311_vm1, 1.0, %v932_v17  ;;  %v208_v31 = vadd.f32 %v192_v14, %v175_v19  ;;  %v209_v32 = vadd.f32 %v193_v15, %v176_v20  ;;  %v31_v40 = vld [vmem:[#allocation2 + $0x100] sm:$0xff]  ;;  %v128_v45 = vld [vmem:[#allocation2 + $0xf0] sm:$0xff]  ;;  %v129_v46 = vld [vmem:[#allocation2 + $0xf8] sm:$0xff] }
  0x22   :  { %v957_v24 = vmul.f32 0.999, %v722_v18  ;;  %v819_v30 = vpack.c.bf16 %v723_v23, %v722_v18  ;;  %v959_v35 = vmul.f32 0.999, %v723_v23  ;;  %v963_v37 = vmul.f32 0.125, %v273_v26  ;;  %v64_v47 = vld [vmem:[#allocation2 + $0x140] sm:$0xff] }
  0x23   :  { %v241_v42 = vadd.f32 %v225_v27, %v208_v31  ;;  %v242_v43 = vadd.f32 %v226_v28, %v209_v32  ;;  %vm312_vm2 = vcmp.ge.f32.partialorder %v961_v36, 0.999  ;;  %v112_v48 = vadd.f32 %v96_v34, %v79_v39  ;;  %v32_v49 = vld [vmem:[#allocation2 + $0x108] sm:$0xff]  ;;  %v161_v56 = vld [vmem:[#allocation2 + $0x230] sm:$0xff]  ;;  %v97_v57 = vld [vmem:[#allocation2 + $0x180] sm:$0xff] }
  0x24   :  { %v342_v41 = vsub.f32 %v949_v0, %v957_v24  ;;  %820 = vst [vmem:[#allocation5] sm:$0xff] %v819_v30   ;;  %vm313_vm3 = vcmp.ge.f32.partialorder %v963_v37, 0.999  ;;  %v65_v50 = vld [vmem:[#allocation2 + $0x148] sm:$0xff]  ;;  %v80_v51 = vadd.f32 %v64_v47, %v31_v40  ;;  %v724_v52 = vsel %vm312_vm2, 1.0, %v932_v17  ;;  %v162_v62 = vld [vmem:[#allocation2 + $0x238] sm:$0xff] }
  0x25   :  { %v725_v53 = vsel %vm313_vm3, 1.0, %v932_v17  ;;  %v274_v54 = vadd.f32 %v258_v33, %v241_v42  ;;  %v275_v55 = vadd.f32 %v259_v38, %v242_v43  ;;  %v343_v58 = vsub.f32 %v951_v6, %v959_v35  ;;  %v194_v63 = vld [vmem:[#allocation2 + $0x270] sm:$0xff]  ;;  %v98_v1 = vld [vmem:[#allocation2 + $0x188] sm:$0xff]  ;;  %v195_v5 = vld [vmem:[#allocation2 + $0x278] sm:$0xff] }
  0x26   :  { %v973_v59 = vmul.f32 0.999, %v724_v52  ;;  %v822_v60 = vpack.c.bf16 %v725_v53, %v724_v52  ;;  %v144_v61 = vadd.f32 %v128_v45, %v111_v44  ;;  %v145_v4 = vadd.f32 %v129_v46, %v112_v48  ;;  %v227_v7 = vld [vmem:[#allocation2 + $0x2b0] sm:$0xff]  ;;  %v130_v9 = vld [vmem:[#allocation2 + $0x1c0] sm:$0xff]  ;;  %v228_v13 = vld [vmem:[#allocation2 + $0x2b8] sm:$0xff] }
  0x27   :  { %v975_v2 = vmul.f32 0.125, %v274_v54  ;;  %v977_v3 = vmul.f32 0.125, %v275_v55  ;;  %v81_v8 = vadd.f32 %v65_v50, %v32_v49  ;;  %v979_v10 = vmul.f32 0.999, %v725_v53  ;;  %v131_v15 = vld [vmem:[#allocation2 + $0x1c8] sm:$0xff]  ;;  %v163_v16 = vld [vmem:[#allocation2 + $0x300] sm:$0xff] }
  0x28   :  { %v344_v11 = vsub.f32 %v961_v36, %v973_v59  ;;  %866 = vst [vmem:[#allocation5 + $0x8] sm:$0xff] %v822_v60   ;;  %v177_v12 = vadd.f32 %v161_v56, %v144_v61  ;;  %v113_v14 = vadd.f32 %v97_v57, %v80_v51  ;;  %v178_v18 = vadd.f32 %v162_v62, %v145_v4  ;;  %v260_v19 = vld [vmem:[#allocation2 + $0x2f0] sm:$0xff]  ;;  %v261_v27 = vld [vmem:[#allocation2 + $0x2f8] sm:$0xff]  ;;  %v164_v29 = vld [vmem:[#allocation2 + $0x308] sm:$0xff] }
  0x29   :  { %vm314_vm4 = vcmp.ge.f32.partialorder %v975_v2, 0.999  ;;  %vm315_vm5 = vcmp.ge.f32.partialorder %v977_v3, 0.999  ;;  %v114_v20 = vadd.f32 %v98_v1, %v81_v8  ;;  %v33_v21 = vld [vmem:[#allocation2 + $0x110] sm:$0xff]  ;;  %v34_v30 = vld [vmem:[#allocation2 + $0x118] sm:$0xff]  ;;  %v345_v49 = vsub.f32 %v963_v37, %v979_v10 }
  0x2a   :  { %v66_v22 = vld [vmem:[#allocation2 + $0x150] sm:$0xff]  ;;  %v726_v23 = vsel %vm314_vm4, 1.0, %v932_v17  ;;  %v727_v25 = vsel %vm315_vm5, 1.0, %v932_v17  ;;  %v210_v26 = vadd.f32 %v194_v63, %v177_v12  ;;  %v146_v28 = vadd.f32 %v130_v9, %v113_v14  ;;  %v67_v31 = vld [vmem:[#allocation2 + $0x158] sm:$0xff]  ;;  %v196_v39 = vld [vmem:[#allocation2 + $0x340] sm:$0xff] }
  0x2b   :  { %v987_v32 = vmul.f32 0.999, %v726_v23  ;;  %v989_v33 = vmul.f32 0.999, %v727_v25  ;;  %v825_v34 = vpack.c.bf16 %v727_v25, %v726_v23  ;;  %v211_v38 = vadd.f32 %v195_v5, %v178_v18  ;;  %v99_v40 = vld [vmem:[#allocation2 + $0x190] sm:$0xff]  ;;  %v197_v45 = vld [vmem:[#allocation2 + $0x348] sm:$0xff] }
  0x2c   :  { %v243_v42 = vadd.f32 %v227_v7, %v210_v26  ;;  %v147_v43 = vadd.f32 %v131_v15, %v114_v20  ;;  %v179_v44 = vadd.f32 %v163_v16, %v146_v28  ;;  %v229_v46 = vld [vmem:[#allocation2 + $0x380] sm:$0xff]  ;;  %v82_v47 = vadd.f32 %v66_v22, %v33_v21  ;;  %v100_v48 = vld [vmem:[#allocation2 + $0x198] sm:$0xff]  ;;  %v230_v52 = vld [vmem:[#allocation2 + $0x388] sm:$0xff] }
  0x2d   :  { %v346_v50 = vsub.f32 %v975_v2, %v987_v32  ;;  %867 = vst [vmem:[#allocation5 + $0x10] sm:$0xff] %v825_v34   ;;  %v244_v51 = vadd.f32 %v228_v13, %v211_v38  ;;  %v262_v53 = vld [vmem:[#allocation2 + $0x3c0] sm:$0xff]  ;;  %v83_v54 = vadd.f32 %v67_v31, %v34_v30  ;;  %v132_v55 = vld [vmem:[#allocation2 + $0x1d0] sm:$0xff]  ;;  %v133_v62 = vld [vmem:[#allocation2 + $0x1d8] sm:$0xff]  ;;  %v347_v4 = vsub.f32 %v977_v3, %v989_v33 }
  0x2e   :  { %v276_v56 = vadd.f32 %v260_v19, %v243_v42  ;;  %v180_v57 = vadd.f32 %v164_v29, %v147_v43  ;;  %v212_v60 = vadd.f32 %v196_v39, %v179_v44  ;;  %v115_v61 = vadd.f32 %v99_v40, %v82_v47  ;;  %v35_v63 = vld [vmem:[#allocation2 + $0x120] sm:$0xff]  ;;  %v36_v1 = vld [vmem:[#allocation2 + $0x128] sm:$0xff]  ;;  %v165_v8 = vld [vmem:[#allocation2 + $0x310] sm:$0xff] }
  0x2f   :  { %v277_v5 = vadd.f32 %v261_v27, %v244_v51  ;;  %v116_v7 = vadd.f32 %v100_v48, %v83_v54  ;;  %v68_v9 = vld [vmem:[#allocation2 + $0x160] sm:$0xff]  ;;  %v69_v12 = vld [vmem:[#allocation2 + $0x168] sm:$0xff]  ;;  %v998_v13 = vmul.f32 1.001001, %v949_v0  ;;  %v166_v19 = vld [vmem:[#allocation2 + $0x318] sm:$0xff] }
  0x30   :  { %v1000_v14 = vmul.f32 0.125, %v276_v56  ;;  %v213_v15 = vadd.f32 %v197_v45, %v180_v57  ;;  %v245_v16 = vadd.f32 %v229_v46, %v212_v60  ;;  %v148_v18 = vadd.f32 %v132_v55, %v115_v61  ;;  %v101_v20 = vld [vmem:[#allocation2 + $0x1a0] sm:$0xff]  ;;  %v263_v22 = vld [vmem:[#allocation2 + $0x3c8] sm:$0xff]  ;;  %v198_v30 = vld [vmem:[#allocation2 + $0x350] sm:$0xff] }
  0x31   :  { %v1002_v21 = vmul.f32 0.125, %v277_v5  ;;  %v149_v23 = vadd.f32 %v133_v62, %v116_v7  ;;  %v84_v25 = vadd.f32 %v68_v9, %v35_v63  ;;  %v85_v26 = vadd.f32 %v69_v12, %v36_v1  ;;  %v199_v31 = vld [vmem:[#allocation2 + $0x358] sm:$0xff]  ;;  %v231_v39 = vld [vmem:[#allocation2 + $0x390] sm:$0xff]  ;;  %v102_v42 = vld [vmem:[#allocation2 + $0x1a8] sm:$0xff] }
  0x32   :  { %vm316_vm6 = vcmp.ge.f32.partialorder %v1000_v14, 0.999  ;;  %v246_v27 = vadd.f32 %v230_v52, %v213_v15  ;;  %v278_v28 = vadd.f32 %v262_v53, %v245_v16  ;;  %v181_v29 = vadd.f32 %v165_v8, %v148_v18  ;;  %v232_v40 = vld [vmem:[#allocation2 + $0x398] sm:$0xff]  ;;  %v264_v48 = vld [vmem:[#allocation2 + $0x3d0] sm:$0xff]  ;;  %v134_v51 = vld [vmem:[#allocation2 + $0x1e0] sm:$0xff] }
  0x33   :  { %vm317_vm7 = vcmp.ge.f32.partialorder %v1002_v21, 0.999  ;;  %v728_v34 = vsel %vm316_vm6, 1.0, %v932_v17  ;;  %v182_v38 = vadd.f32 %v166_v19, %v149_v23  ;;  %v117_v43 = vadd.f32 %v101_v20, %v84_v25  ;;  %v135_v56 = vld [vmem:[#allocation2 + $0x1e8] sm:$0xff]  ;;  %v37_v57 = vld [vmem:[#allocation2 + $0x130] sm:$0xff]  ;;  %v265_v1 = vld [vmem:[#allocation2 + $0x3d8] sm:$0xff] }
  0x34   :  { %v729_v44 = vsel %vm317_vm7, 1.0, %v932_v17  ;;  %v1008_v45 = vmul.f32 0.999, %v728_v34  ;;  %v279_v46 = vadd.f32 %v263_v22, %v246_v27  ;;  %v1010_v47 = vmul.f32 0.125, %v278_v28  ;;  %v70_v60 = vld [vmem:[#allocation2 + $0x170] sm:$0xff]  ;;  %v167_v7 = vld [vmem:[#allocation2 + $0x320] sm:$0xff] }
  0x35   :  { %v1012_v52 = vmul.f32 0.999, %v729_v44  ;;  %v828_v53 = vpack.c.bf16 %v729_v44, %v728_v34  ;;  %v214_v54 = vadd.f32 %v198_v30, %v181_v29  ;;  %v215_v55 = vadd.f32 %v199_v31, %v182_v38  ;;  %v168_v8 = vld [vmem:[#allocation2 + $0x328] sm:$0xff]  ;;  %v38_v18 = vld [vmem:[#allocation2 + $0x138] sm:$0xff]  ;;  %v103_v20 = vld [vmem:[#allocation2 + $0x1b0] sm:$0xff] }
  0x36   :  { %v348_v61 = vsub.f32 %v1000_v14, %v1008_v45  ;;  %v1016_v62 = vmul.f32 0.125, %v279_v46  ;;  %v390_v63 = vadd.f32 %v342_v41, %v1010_v47  ;;  %v118_v5 = vadd.f32 %v102_v42, %v85_v26  ;;  %v71_v19 = vld [vmem:[#allocation2 + $0x178] sm:$0xff]  ;;  %v200_v22 = vld [vmem:[#allocation2 + $0x360] sm:$0xff]  ;;  %v201_v29 = vld [vmem:[#allocation2 + $0x368] sm:$0xff] }
  0x37   :  { %v349_v9 = vsub.f32 %v1002_v21, %v1012_v52  ;;  %868 = vst [vmem:[#allocation5 + $0x18] sm:$0xff] %v828_v53   ;;  %v247_v12 = vadd.f32 %v231_v39, %v214_v54  ;;  %v248_v15 = vadd.f32 %v232_v40, %v215_v55  ;;  %v150_v16 = vadd.f32 %v134_v51, %v117_v43  ;;  %v104_v30 = vld [vmem:[#allocation2 + $0x1b8] sm:$0xff]  ;;  %v136_v31 = vld [vmem:[#allocation2 + $0x1f0] sm:$0xff]  ;;  %v233_v38 = vld [vmem:[#allocation2 + $0x3a0] sm:$0xff] }
  0x38   :  { %v391_v24 = vadd.f32 %v343_v58, %v1016_v62  ;;  %vm398_vm8 = vcmp.ge.f32.partialorder %v390_v63, 0.999  ;;  %v151_v41 = vadd.f32 %v135_v56, %v118_v5  ;;  %v86_v23 = vadd.f32 %v70_v60, %v37_v57  ;;  %v234_v44 = vld [vmem:[#allocation2 + $0x3a8] sm:$0xff]  ;;  %v137_v46 = vld [vmem:[#allocation2 + $0x1f8] sm:$0xff]  ;;  %v266_v54 = vld [vmem:[#allocation2 + $0x3e0] sm:$0xff] }
  0x39   :  { %v738_v25 = vsel %vm398_vm8, 1.0, %v932_v17  ;;  %v280_v26 = vadd.f32 %v264_v48, %v247_v12  ;;  %v281_v27 = vadd.f32 %v265_v1, %v248_v15  ;;  %v183_v28 = vadd.f32 %v167_v7, %v150_v16  ;;  %v169_v48 = vld [vmem:[#allocation2 + $0x330] sm:$0xff]  ;;  %v267_v1 = vld [vmem:[#allocation2 + $0x3e8] sm:$0xff]  ;;  %v170_v5 = vld [vmem:[#allocation2 + $0x338] sm:$0xff] }
  0x3a   :  { %vm399_vm9 = vcmp.ge.f32.partialorder %v391_v24, 0.999  ;;  %v184_v34 = vadd.f32 %v168_v8, %v151_v41  ;;  %v87_v39 = vadd.f32 %v71_v19, %v38_v18  ;;  %v119_v40 = vadd.f32 %v103_v20, %v86_v23  ;;  %v202_v16 = vld [vmem:[#allocation2 + $0x370] sm:$0xff] }
  0x3b   :  { %v739_v35 = vsel %vm399_vm9, 1.0, %v932_v17  ;;  %v1030_v58 = vmul.f32 0.125, %v280_v26  ;;  %v1032_v42 = vmul.f32 0.125, %v281_v27  ;;  %v216_v43 = vadd.f32 %v200_v22, %v183_v28  ;;  %v235_v41 = vld [vmem:[#allocation2 + $0x3b0] sm:$0xff]  ;;  %v236_v26 = vld [vmem:[#allocation2 + $0x3b8] sm:$0xff] }
  0x3c   :  { %v831_v51 = vpack.c.bf16 %v739_v35, %v738_v25  ;;  %v217_v53 = vadd.f32 %v201_v29, %v184_v34  ;;  %v120_v55 = vadd.f32 %v104_v30, %v87_v39  ;;  %v152_v56 = vadd.f32 %v136_v31, %v119_v40  ;;  %v268_v29 = vld [vmem:[#allocation2 + $0x3f0] sm:$0xff]  ;;  %v269_v39 = vld [vmem:[#allocation2 + $0x3f8] sm:$0xff] }
  0x3d   :  { %v392_v57 = vadd.f32 %v344_v11, %v1030_v58  ;;  %v393_v60 = vadd.f32 %v345_v49, %v1032_v42  ;;  %v249_v63 = vadd.f32 %v233_v38, %v216_v43  ;;  %v464_v7 = vmul.f32 1.001001, %v951_v6  ;;  %v203_v11 = vld [vmem:[#allocation2 + $0x378] sm:$0xff] }
  0x3e   :  { %832 = vst [vmem:[#allocation5 + $0x20] sm:$0xff] %v831_v51   ;;  %v250_v8 = vadd.f32 %v234_v44, %v217_v53  ;;  %v153_v12 = vadd.f32 %v137_v46, %v120_v55  ;;  %v185_v15 = vadd.f32 %v169_v48, %v152_v56  ;;  %v479_v18 = vfloor.f32 %v998_v13 }
  0x3f   :  { %vm400_vm10 = vcmp.ge.f32.partialorder %v392_v57, 0.999  ;;  %vm401_vm11 = vcmp.ge.f32.partialorder %v393_v60, 0.999  ;;  %v282_v59 = vadd.f32 %v266_v54, %v249_v63  ;;  %v480_v19 = vfloor.f32 %v464_v7 }
  0x40   :  { %v740_v10 = vsel %vm400_vm10, 1.0, %v932_v17  ;;  %v741_v49 = vsel %vm401_vm11, 1.0, %v932_v17  ;;  %v283_v20 = vadd.f32 %v267_v1, %v250_v8  ;;  %v186_v24 = vadd.f32 %v170_v5, %v153_v12 }
  0x41   :  { %v834_v22 = vpack.c.bf16 %v741_v49, %v740_v10  ;;  %v1046_v23 = vmul.f32 0.125, %v282_v59  ;;  %v218_v25 = vadd.f32 %v202_v16, %v185_v15  ;;  %v495_v27 = vmul.f32 0.999, %v479_v18 }
  0x42   :  { %v1048_v28 = vmul.f32 0.125, %v283_v20  ;;  %v219_v13 = vadd.f32 %v203_v11, %v186_v24  ;;  %v496_v30 = vmul.f32 0.999, %v480_v19  ;;  %v465_v31 = vmul.f32 1.001001, %v961_v36 }
  0x43   :  { %869 = vst [vmem:[#allocation5 + $0x28] sm:$0xff] %v834_v22   ;;  %v394_v34 = vadd.f32 %v346_v50, %v1046_v23  ;;  %v251_v38 = vadd.f32 %v235_v41, %v218_v25  ;;  %v511_v40 = vsub.f32 %v949_v0, %v495_v27  ;;  %v466_v35 = vmul.f32 1.001001, %v963_v37 }
  0x44   :  { %v395_v43 = vadd.f32 %v347_v4, %v1048_v28  ;;  %v252_v44 = vadd.f32 %v236_v26, %v219_v13  ;;  %v512_v46 = vsub.f32 %v951_v6, %v496_v30  ;;  %v481_v48 = vfloor.f32 %v465_v31 }
  0x45   :  { %vm402_vm12 = vcmp.ge.f32.partialorder %v394_v34, 0.999  ;;  %v284_v51 = vadd.f32 %v268_v29, %v251_v38  ;;  %v1063_v32 = vadd.f32 %v511_v40, %v949_v0  ;;  %v482_v50 = vfloor.f32 %v466_v35 }
  0x46   :  { %vm403_vm13 = vcmp.ge.f32.partialorder %v395_v43, 0.999  ;;  %v742_v53 = vsel %vm402_vm12, 1.0, %v932_v17  ;;  %v285_v54 = vadd.f32 %v269_v39, %v252_v44  ;;  %v1067_v55 = vadd.f32 %v512_v46, %v951_v6 }
  0x47   :  { %v743_v33 = vsel %vm403_vm13, 1.0, %v932_v17  ;;  %v1070_v4 = vmul.f32 0.125, %v284_v51  ;;  %vm551_vm14 = vcmp.ge.f32.partialorder %v1063_v32, 0.999  ;;  %v497_v56 = vmul.f32 0.999, %v481_v48 }
  0x48   :  { %v837_v57 = vpack.c.bf16 %v743_v33, %v742_v53  ;;  %v1073_v60 = vmul.f32 0.125, %v285_v54  ;;  %vm552_vm15 = vcmp.ge.f32.partialorder %v1067_v55, 0.999  ;;  %v754_v0 = vsel %vm551_vm14, 1.0, %v932_v17 }
  0x49   :  { %v396_v6 = vadd.f32 %v348_v61, %v1070_v4  ;;  %v755_v63 = vsel %vm552_vm15, 1.0, %v932_v17  ;;  %v498_v1 = vmul.f32 0.999, %v482_v50  ;;  %v513_v8 = vsub.f32 %v961_v36, %v497_v56 }
  0x4a   :  { %870 = vst [vmem:[#allocation5 + $0x30] sm:$0xff] %v837_v57   ;;  %v397_v5 = vadd.f32 %v349_v9, %v1073_v60  ;;  %v843_v7 = vpack.c.bf16 %v755_v63, %v754_v0  ;;  %v1087_v12 = vmul.f32 0.999, %v754_v0  ;;  %v467_v45 = vmul.f32 1.001001, %v975_v2 }
  0x4b   :  { %vm404_vm0 = vcmp.ge.f32.partialorder %v396_v6, 0.999  ;;  %v514_v15 = vsub.f32 %v963_v37, %v498_v1  ;;  %v1092_v16 = vmul.f32 0.999, %v755_v63  ;;  %v1095_v18 = vadd.f32 %v513_v8, %v961_v36 }
  0x4c   :  { %vm405_vm1 = vcmp.ge.f32.partialorder %v397_v5, 0.999  ;;  %v744_v61 = vsel %vm404_vm0, 1.0, %v932_v17  ;;  %844 = vst [vmem:[#allocation5 + $0x40] sm:$0xff] %v843_v7   ;;  %v468_v59 = vmul.f32 1.001001, %v977_v3  ;;  %v483_v11 = vfloor.f32 %v467_v45 }
  0x4d   :  { %v745_v52 = vsel %vm405_vm1, 1.0, %v932_v17  ;;  %v1099_v9 = vadd.f32 %v514_v15, %v963_v37  ;;  %vm553_vm2 = vcmp.ge.f32.partialorder %v1095_v18, 0.999  ;;  %v469_v10 = vmul.f32 1.001001, %v1000_v14 }
  0x4e   :  { %v840_v19 = vpack.c.bf16 %v745_v52, %v744_v61  ;;  %v470_v49 = vmul.f32 1.001001, %v1002_v21  ;;  %v484_v20 = vfloor.f32 %v468_v59  ;;  %v499_v36 = vmul.f32 0.999, %v483_v11 }
  0x4f   :  { %vm554_vm3 = vcmp.ge.f32.partialorder %v1099_v9, 0.999  ;;  %v756_v24 = vsel %vm553_vm2, 1.0, %v932_v17  ;;  %v485_v41 = vfloor.f32 %v469_v10  ;;  %v583_v25 = vsub.f32 %v1063_v32, %v1087_v12 }
  0x50   :  { %871 = vst [vmem:[#allocation5 + $0x38] sm:$0xff] %v840_v19   ;;  %v757_v37 = vsel %vm554_vm3, 1.0, %v932_v17  ;;  %v486_v22 = vfloor.f32 %v470_v49  ;;  %v500_v27 = vmul.f32 0.999, %v484_v20  ;;  %v515_v13 = vsub.f32 %v975_v2, %v499_v36 }
  0x51   :  { %v846_v26 = vpack.c.bf16 %v757_v37, %v756_v24  ;;  %v584_v29 = vsub.f32 %v1067_v55, %v1092_v16  ;;  %v501_v30 = vmul.f32 0.999, %v485_v41  ;;  %v471_v34 = vmul.f32 1.001001, %v1010_v47 }
  0x52   :  { %v502_v31 = vmul.f32 0.999, %v486_v22  ;;  %v1114_v38 = vmul.f32 0.999, %v756_v24  ;;  %v516_v39 = vsub.f32 %v977_v3, %v500_v27  ;;  %v1118_v40 = vadd.f32 %v515_v13, %v975_v2 }
  0x53   :  { %872 = vst [vmem:[#allocation5 + $0x48] sm:$0xff] %v846_v26   ;;  %v472_v35 = vmul.f32 1.001001, %v1016_v62  ;;  %v517_v43 = vsub.f32 %v1000_v14, %v501_v30  ;;  %v487_v46 = vfloor.f32 %v471_v34  ;;  %v473_v48 = vmul.f32 1.001001, %v1030_v58 }
  0x54   :  { %v518_v44 = vsub.f32 %v1002_v21, %v502_v31  ;;  %v578_v51 = vmul.f32 0.999, %v757_v37  ;;  %v1125_v32 = vadd.f32 %v516_v39, %v977_v3  ;;  %vm555_vm4 = vcmp.ge.f32.partialorder %v1118_v40, 0.999 }
  0x55   :  { %v488_v50 = vfloor.f32 %v472_v35  ;;  %v758_v53 = vsel %vm555_vm4, 1.0, %v932_v17  ;;  %v1130_v2 = vadd.f32 %v517_v43, %v1000_v14  ;;  %v503_v55 = vmul.f32 0.999, %v487_v46 }
  0x56   :  { %v1133_v54 = vadd.f32 %v518_v44, %v1002_v21  ;;  %vm556_vm5 = vcmp.ge.f32.partialorder %v1125_v32, 0.999  ;;  %v474_v56 = vmul.f32 1.001001, %v1032_v42  ;;  %v489_v57 = vfloor.f32 %v473_v48 }
  0x57   :  { %v504_v33 = vmul.f32 0.999, %v488_v50  ;;  %v759_v3 = vsel %vm556_vm5, 1.0, %v932_v17  ;;  %vm557_vm6 = vcmp.ge.f32.partialorder %v1130_v2, 0.999  ;;  %v519_v0 = vsub.f32 %v1010_v47, %v503_v55 }
  0x58   :  { %vm558_vm7 = vcmp.ge.f32.partialorder %v1133_v54, 0.999  ;;  %v585_v14 = vsub.f32 %v1095_v18, %v1114_v38  ;;  %v579_v21 = vmul.f32 0.999, %v758_v53  ;;  %v849_v6 = vpack.c.bf16 %v759_v3, %v758_v53 }
  0x59   :  { %v760_v63 = vsel %vm557_vm6, 1.0, %v932_v17  ;;  %v586_v1 = vsub.f32 %v1099_v9, %v578_v51  ;;  %v761_v5 = vsel %vm558_vm7, 1.0, %v932_v17  ;;  %v520_v7 = vsub.f32 %v1016_v62, %v504_v33 }
  0x5a   :  { %v535_v8 = vadd.f32 %v519_v0, %v1010_v47  ;;  %v580_v12 = vmul.f32 0.999, %v759_v3  ;;  %873 = vst [vmem:[#allocation5 + $0x50] sm:$0xff] %v849_v6   ;;  %v581_v15 = vmul.f32 0.999, %v760_v63  ;;  %v852_v45 = vpack.c.bf16 %v761_v5, %v760_v63 }
  0x5b   :  { %v490_v61 = vfloor.f32 %v474_v56  ;;  %v582_v16 = vmul.f32 0.999, %v761_v5  ;;  %v536_v18 = vadd.f32 %v520_v7, %v1016_v62  ;;  %v505_v59 = vmul.f32 0.999, %v489_v57 }
  0x5c   :  { %v632_v52 = vadd.f32 %v583_v25, %v535_v8  ;;  %v587_v11 = vsub.f32 %v1118_v40, %v579_v21  ;;  %874 = vst [vmem:[#allocation5 + $0x58] sm:$0xff] %v852_v45   ;;  %v475_v19 = vmul.f32 1.001001, %v1046_v23  ;;  %v476_v10 = vmul.f32 1.001001, %v1048_v28 }
  0x5d   :  { %v506_v9 = vmul.f32 0.999, %v490_v61  ;;  %v633_v49 = vadd.f32 %v584_v29, %v536_v18  ;;  %v521_v47 = vsub.f32 %v1030_v58, %v505_v59  ;;  %v477_v20 = vmul.f32 1.001001, %v1070_v4 }
  0x5e   :  { %vm640_vm8 = vcmp.ge.f32.partialorder %v632_v52, 0.999  ;;  %v491_v24 = vfloor.f32 %v475_v19  ;;  %v492_v37 = vfloor.f32 %v476_v10  ;;  %v478_v22 = vmul.f32 1.001001, %v1073_v60 }
  0x5f   :  { %v770_v36 = vsel %vm640_vm8, 1.0, %v932_v17  ;;  %v522_v62 = vsub.f32 %v1032_v42, %v506_v9  ;;  %vm641_vm9 = vcmp.ge.f32.partialorder %v633_v49, 0.999  ;;  %v537_v41 = vadd.f32 %v521_v47, %v1030_v58 }
  0x60   :  { %v493_v25 = vfloor.f32 %v477_v20  ;;  %v771_v26 = vsel %vm641_vm9, 1.0, %v932_v17  ;;  %v507_v13 = vmul.f32 0.999, %v491_v24  ;;  %v508_v29 = vmul.f32 0.999, %v492_v37 }
  0x61   :  { %v538_v27 = vadd.f32 %v522_v62, %v1032_v42  ;;  %v855_v30 = vpack.c.bf16 %v771_v26, %v770_v36  ;;  %v634_v31 = vadd.f32 %v585_v14, %v537_v41  ;;  %v494_v34 = vfloor.f32 %v478_v22 }
  0x62   :  { %v509_v38 = vmul.f32 0.999, %v493_v25  ;;  %v588_v39 = vsub.f32 %v1125_v32, %v580_v12  ;;  %v523_v35 = vsub.f32 %v1046_v23, %v507_v13  ;;  %v524_v58 = vsub.f32 %v1048_v28, %v508_v29 }
  0x63   :  { %v635_v40 = vadd.f32 %v586_v1, %v538_v27  ;;  %v589_v43 = vsub.f32 %v1130_v2, %v581_v15  ;;  %856 = vst [vmem:[#allocation5 + $0x60] sm:$0xff] %v855_v30   ;;  %vm642_vm10 = vcmp.ge.f32.partialorder %v634_v31, 0.999  ;;  %v510_v44 = vmul.f32 0.999, %v494_v34 }
  0x64   :  { %v525_v42 = vsub.f32 %v1070_v4, %v509_v38  ;;  %v772_v46 = vsel %vm642_vm10, 1.0, %v932_v17  ;;  %v539_v48 = vadd.f32 %v523_v35, %v1046_v23  ;;  %v540_v51 = vadd.f32 %v524_v58, %v1048_v28 }
  0x65   :  { %vm643_vm11 = vcmp.ge.f32.partialorder %v635_v40, 0.999  ;;  %v590_v32 = vsub.f32 %v1133_v54, %v582_v16  ;;  %v526_v53 = vsub.f32 %v1073_v60, %v510_v44 }
  0x66   :  { %v773_v50 = vsel %vm643_vm11, 1.0, %v932_v17  ;;  %v541_v2 = vadd.f32 %v525_v42, %v1070_v4  ;;  %v636_v33 = vadd.f32 %v587_v11, %v539_v48  ;;  %v637_v56 = vadd.f32 %v588_v39, %v540_v51 }
  0x67   :  { %v858_v55 = vpack.c.bf16 %v773_v50, %v772_v46  ;;  %v542_v57 = vadd.f32 %v526_v53, %v1073_v60 }
  0x68   :  { %v638_v3 = vadd.f32 %v589_v43, %v541_v2  ;;  %vm644_vm12 = vcmp.ge.f32.partialorder %v636_v33, 0.999  ;;  %vm645_vm13 = vcmp.ge.f32.partialorder %v637_v56, 0.999 }
  0x69   :  { %875 = vst [vmem:[#allocation5 + $0x68] sm:$0xff] %v858_v55   ;;  %v774_v23 = vsel %vm644_vm12, 1.0, %v932_v17  ;;  %v775_v28 = vsel %vm645_vm13, 1.0, %v932_v17  ;;  %v639_v54 = vadd.f32 %v590_v32, %v542_v57 }
  0x6a   :  { %vm646_vm14 = vcmp.ge.f32.partialorder %v638_v3, 0.999  ;;  %v861_v0 = vpack.c.bf16 %v775_v28, %v774_v23 }
  0x6b   :  { %v776_v14 = vsel %vm646_vm14, 1.0, %v932_v17  ;;  %vm647_vm15 = vcmp.ge.f32.partialorder %v639_v54, 0.999 }
  0x6c   :  { %876 = vst [vmem:[#allocation5 + $0x70] sm:$0xff] %v861_v0   ;;  %v777_v4 = vsel %vm647_vm15, 1.0, %v932_v17 }
  0x6d   :  { %v864_v60 = vpack.c.bf16 %v777_v4, %v776_v14 }
  0x6f   :  { %877 = vst [vmem:[#allocation5 + $0x78] sm:$0xff] %v864_v60  }
  0x70   :  { %916 = shalt.err (!%p913_p9)
}
  0x71   :  { %s934_s15 = smov 64   ;;  %s935_s16 = smov 4  }
  0x72   :  { %716 = dma.vmem_to_hbm [thread:$0]  %s711_s13, 2048, %s1181_s1, [#allocation4], %s934_s15, %s934_s15, %s935_s16  }
  0x73   :  { %927 = dma.done.wait [#allocation4], 2048  }
  0x74   :  { %928 = vsyncadd [#allocation4], 4294965248 }
  0x75   :  { %720 = vsyncpa [#allocation3], 1 }
  0x76   :  { %721 = vsyncpa [#allocation4], 1 }

</bundles_post_ra>
